<compile_context>
chip_gen: v6e
topology: v6e:2x2x1
jax: 0.10.0
libtpu: 0.0.40
codegen_flags: <defaults>
</compile_context>

<pallas_src>
import functools

import jax
import jax.numpy as jnp
from jax.experimental import pallas as pl
from jax.experimental.pallas import tpu as pltpu

_LANES = 128
_SUBLANES = 8
_MIB = 1024 * 1024


def _mish_kernel(x_ref, o_ref, *, newton_steps):
    """y = x * tanh(softplus(x)), single-transcendental form.

    tanh(softplus(x)) = ((1+e^x)^2 - 1) / ((1+e^x)^2 + 1) = u / (u + 2),
    with u = e^x * (e^x + 2)  (no cancellation for very negative x).
    x is clamped at 20 so u stays finite in f32; for x > 20 the exact factor
    is 1.0 to f32 precision and u/(u+2) evaluates to 1.0 within ~1 ulp, so no
    extra compare/select is needed (VALU is the scarce slot on v7x / bf16).
    """
    xf = x_ref[...].astype(jnp.float32)
    xs = jnp.minimum(xf, 20.0)
    e = jnp.exp(xs)                        # EUP transcendental
    u = e * (e + 2.0)
    d = u + 2.0
    r = pl.reciprocal(d, approx=True)      # EUP vrcp (approx)
    for _ in range(newton_steps):          # 1 step -> ~f32 accuracy; 0 for bf16
        r = r * (2.0 - d * r)
    o_ref[...] = (xf * (u * r)).astype(o_ref.dtype)


def _tpu_tuning():
    """Return (vmem_limit_bytes, target_block_bytes), generation aware."""
    vmem_phys = None
    try:
        info = pltpu.get_tpu_info()
        vmem_phys = getattr(info, "vmem_capacity_bytes", None)
    except Exception:
        vmem_phys = None
    if vmem_phys is None:
        return 32 * _MIB, 4 * _MIB            # safe on every generation
    if vmem_phys <= 64 * _MIB:                # v7x: 64 MiB physical per TC
        return 48 * _MIB, 6 * _MIB
    return 64 * _MIB, 6 * _MIB                # v5e / v6e: 128 MiB physical


def _block_rows(rows, itemsize, target_block_bytes):
    """Row count per block: ~target bytes, multiple of the sublane quantum."""
    sub = max(_SUBLANES, 32 // itemsize)      # f32: 8, bf16/f16: 16, int8: 32
    br = max(sub, target_block_bytes // (_LANES * itemsize))
    br = min(br, rows)
    if rows >= sub:
        br = max(sub, (br // sub) * sub)
    else:
        br = rows
    # If one block would cover everything, split so the grid has >= 2 steps
    # (lets a v7x megacore shard the axis; harmless elsewhere).
    if br == rows and rows >= 2 * sub:
        half = -(-rows // 2)
        br = min(rows, -(-half // sub) * sub)
    return br


def mish(x: jax.Array, *, block_rows=None, donate: bool = False) -> jax.Array:
    """Mish activation, elementwise, any shape / floating dtype.

    `donate=True` aliases the (flattened) input buffer to the output; only
    useful when the caller actually donates x (jax.jit donate_argnums),
    otherwise XLA inserts a defensive copy, so it is off by default.
    """
    orig_shape = x.shape
    dtype = x.dtype
    n = x.size
    itemsize = jnp.dtype(dtype).itemsize
    vmem_limit, target_block_bytes = _tpu_tuning()
    newton_steps = 1 if itemsize >= 4 else 0   # f32 needs 1; bf16/f16 need 0

    compiler_params = pltpu.CompilerParams(
        # TODO(synk): on v7x, sweep pltpu.CORE_PARALLEL (or an explicit
        # core_map split) and pl.Buffered(3) and confirm both TCs run grid
        # steps in xprof; plain "parallel" is the safe portable default.
        dimension_semantics=("parallel",),
        vmem_limit_bytes=vmem_limit,
    )
    io_alias = {0: 0} if donate else {}
    kernel = functools.partial(_mish_kernel, newton_steps=newton_steps)

    flat = x.reshape(-1)

    if n % _LANES == 0:
        # Lane-dense (rows, 128) slab: free reshape, single HBM pass.
        rows = n // _LANES
        if block_rows is None:
            br = _block_rows(rows, itemsize, target_block_bytes)
        else:
            br = max(1, min(block_rows, rows))
        slab = flat.reshape(rows, _LANES)
        out = pl.pallas_call(
            kernel,
            out_shape=jax.ShapeDtypeStruct((rows, _LANES), dtype),
            grid_spec=pltpu.PrefetchScalarGridSpec(
                num_scalar_prefetch=0,
                grid=(pl.cdiv(rows, br),),
                in_specs=[pl.BlockSpec((br, _LANES), lambda i: (i, 0))],
                out_specs=pl.BlockSpec((br, _LANES), lambda i: (i, 0)),
            ),
            input_output_aliases=io_alias,
            compiler_params=compiler_params,
        )(slab)
        return out.reshape(orig_shape)

    # Ragged size: stream the flat 1-D array directly; Pallas masks the
    # partial last block, so there is no pad / slice extra HBM pass.
    if block_rows is None:
        blk = max(_SUBLANES, target_block_bytes // (_LANES * itemsize)) * _LANES
    else:
        blk = max(1, block_rows) * _LANES
    if n <= blk:
        blk = n                                   # full array, grid of 1
        grid = 1
    else:
        quantum = _SUBLANES * _LANES * max(1, 4 // itemsize)
        blk = max(quantum, (blk // quantum) * quantum)
        grid = pl.cdiv(n, blk)
    out = pl.pallas_call(
        kernel,
        out_shape=jax.ShapeDtypeStruct((n,), dtype),
        grid_spec=pltpu.PrefetchScalarGridSpec(
            num_scalar_prefetch=0,
            grid=(grid,),
            in_specs=[pl.BlockSpec((blk,), lambda i: (i,))],
            out_specs=pl.BlockSpec((blk,), lambda i: (i,)),
        ),
        input_output_aliases=io_alias,
        compiler_params=compiler_params,
    )(flat)
    return out.reshape(orig_shape)


def _mish_ref(x):
    # Pure-JAX reference: matches torch `x * tanh(F.softplus(x))`.
    xf = x.astype(jnp.float32)
    return (xf * jnp.tanh(jax.nn.softplus(xf))).astype(x.dtype)


if __name__ == "__main__":
    key = jax.random.PRNGKey(0)
    k1, k2, k3 = jax.random.split(key, 3)

    # 1) f32, NCHW conv-activation shape (size is a multiple of 128).
    x = jax.random.normal(k1, (2, 4, 16, 16), dtype=jnp.float32) * 3.0
    y = jax.block_until_ready(mish(x))
    y_ref = _mish_ref(x)
    assert y.shape == x.shape and y.dtype == x.dtype
    assert jnp.allclose(y, y_ref, atol=1e-4, rtol=1e-4), "f32 mismatch vs reference"

    # 2) bf16 (16-row sublane quantum, 0 Newton steps on the approx reciprocal).
    xb = (jax.random.normal(k2, (2, 4, 16, 16), dtype=jnp.float32) * 3.0).astype(jnp.bfloat16)
    yb = jax.block_until_ready(mish(xb))
    yb_ref = _mish_ref(xb)
    assert yb.shape == xb.shape and yb.dtype == jnp.bfloat16
    assert jnp.allclose(yb.astype(jnp.float32), yb_ref.astype(jnp.float32),
                        atol=2e-2, rtol=2e-2), "bf16 mismatch vs reference"

    # 3) ragged size (not a multiple of 128): 1-D streaming path, no pad/slice.
    xr = jax.random.normal(k3, (3, 5, 31), dtype=jnp.float32) * 3.0
    yr = jax.block_until_ready(mish(xr))
    yr_ref = _mish_ref(xr)
    assert yr.shape == xr.shape and yr.dtype == xr.dtype
    assert jnp.allclose(yr, yr_ref, atol=1e-4, rtol=1e-4), "ragged mismatch vs reference"

    print("KERNEL_OK")
</pallas_src>

<mosaic_0001>
module attributes {stable_mosaic.version = 11 : i64} {
  func.func @_mish_kernel(%arg0: i32, %arg1: memref<8x128xf32, #tpu.memory_space<vmem>>, %arg2: memref<8x128xf32, #tpu.memory_space<vmem>>) attributes {dimension_semantics = [#tpu.dimension_semantics<parallel>], iteration_bounds = array<i64: 2>, scalar_prefetch = 0 : i64, scratch_operands = 0 : i64, tpu.core_type = #tpu.core_type<tc>, window_params = [{transform_indices = @transform_0, window_bounds = array<i64: 8, 128>}, {transform_indices = @transform_1, window_bounds = array<i64: 8, 128>}]} {
    %c0 = arith.constant 0 : index
    %c0_0 = arith.constant 0 : index
    %0 = vector.load %arg1[%c0, %c0_0] : memref<8x128xf32, #tpu.memory_space<vmem>>, vector<8x128xf32>
    %cst = arith.constant 2.000000e+01 : f32
    %1 = vector.broadcast %cst : f32 to vector<8x128xf32>
    %2 = arith.minimumf %0, %1 : vector<8x128xf32>
    %3 = math.exp %2 : vector<8x128xf32>
    %cst_1 = arith.constant 2.000000e+00 : f32
    %4 = vector.broadcast %cst_1 : f32 to vector<8x128xf32>
    %5 = arith.addf %3, %4 : vector<8x128xf32>
    %6 = arith.mulf %3, %5 : vector<8x128xf32>
    %cst_2 = arith.constant 2.000000e+00 : f32
    %7 = vector.broadcast %cst_2 : f32 to vector<8x128xf32>
    %8 = arith.addf %6, %7 : vector<8x128xf32>
    %9 = tpu.reciprocal %8 {approx = true} : vector<8x128xf32> -> vector<8x128xf32>
    %10 = arith.mulf %8, %9 : vector<8x128xf32>
    %cst_3 = arith.constant 2.000000e+00 : f32
    %11 = vector.broadcast %cst_3 : f32 to vector<8x128xf32>
    %12 = arith.subf %11, %10 : vector<8x128xf32>
    %13 = arith.mulf %9, %12 : vector<8x128xf32>
    %14 = arith.mulf %6, %13 : vector<8x128xf32>
    %15 = arith.mulf %0, %14 : vector<8x128xf32>
    %c0_4 = arith.constant 0 : index
    %c0_5 = arith.constant 0 : index
    %16 = vector.load %arg2[%c0_4, %c0_5] : memref<8x128xf32, #tpu.memory_space<vmem>>, vector<8x128xf32>
    tpu.vector_store %arg2[%c0_4, %c0_5], %15 {strides = array<i32>} : memref<8x128xf32, #tpu.memory_space<vmem>>, vector<8x128xf32>,
    return
  }
  func.func @transform_0(%arg0: i32) -> (i32, i32) {
    %c0_i32 = arith.constant 0 : i32
    %c0_i32_0 = arith.constant 0 : i32
    return %arg0, %c0_i32 : i32, i32
  }
  func.func @transform_1(%arg0: i32) -> (i32, i32) {
    %c0_i32 = arith.constant 0 : i32
    %c0_i32_0 = arith.constant 0 : i32
    return %arg0, %c0_i32 : i32, i32
  }
}

</mosaic_0001>

<bundles_post_ra>
// kernel: tpu_custom_call.1
= control target key start
LH: loop header
LB: loop body
LE: loop exit
PB: predicated region body
PF: predicated region fallthrough
CT: control target
= control target key end

     0   :  { %6 = vsyncpa [#allocation3], 0  ;;  %s539_s0 = inlined_call_operand.hbm [shape: f32[16,128], index: 0, kind: input, shape index: {}]   ;;  %s540_s1 = inlined_call_operand.hbm [shape: f32[16,128], index: 1, kind: output, shape index: {}]  }
   0x1   :  { %8 = vsyncpa [#allocation3 + $0x1], 0 }
   0x2   :  { %9 = vsyncpa [#allocation4], 0 }
   0x3   :  { %11 = vsyncpa [#allocation4 + $0x1], 0  ;;  %s398_s6 = smov 0   ;;  %s400_s7 = smov 0  }
   0x4   :  { %s402_s8 = smov 0   ;;  %s404_s9 = smov 0  }
   0x5 LB: > { %s419_s10 = sadd.s32 4294967295, %s384_s9   ;;  %s230_s11 = sadd.s32 4294967294, %s384_s9   ;;  %s384_s9 = sphi %s404_s9, %s557_s9   ;;  %s380_s8 = sphi %s402_s8, %s556_s8   ;;  %s376_s7 = sphi %s400_s7, %s555_s7   ;;  %s372_s6 = sphi %s398_s6, %s554_s6  }
   0x6   : > { %s423_s12 = sadd.s32 1, %s384_s9   ;;  %s24_s13 = sadd.s32 1, %s380_s8 }
   0x7   : > { %s21_s14 = ssub.s32 %s384_s9, %s423_s12  ;;  %p31_p0 = scmp.ne.s32.totalorder %s380_s8, %s376_s7 }
   0x8   : > { %p22_p1 = scmp.eq.s32.totalorder %s21_s14, 0  ;;  %p32_p2 = scmp.eq.s32.totalorder %s384_s9, 0 }
   0x9   : > { %p37_p3 = scmp.ne.s32.totalorder %s376_s7, %s372_s6  ;;  %p38_p4 = scmp.eq.s32.totalorder %s419_s10, 0 }
   0xa   : > { %s435_s15 = scalar_select %p22_p1, %s380_s8, %s24_s13  }
   0xb   : > { %p437_p5 = por %p32_p2, %p31_p0  ;;  %p441_p6 = por %p38_p4, %p37_p3 }
   0xc   : > { %p61_p7 = scmp.eq.s32.totalorder %s419_s10, 1  ;;  %p67_p8 = scmp.eq.s32.totalorder %s230_s11, 1 }
   0xd   : > { %s544_s17 = scalar_select %p441_p6, 1, 0 }
   0xe   : > { %p254_p10 = scmp.lt.s32.totalorder %s384_s9, 2  ;;  %p448_p11 = por %p61_p7, %p31_p0 }
   0xf   : > { %p452_p12 = por %p67_p8, %p37_p3  ;;  %s87_s20 = sand.u32 1, %s380_s8  }
  0x10   : > { %s545_s18 = scalar_select %p448_p11, 1, 0 }
  0x11   : > { %s546_s19 = scalar_select %p452_p12, 1, 0 }
  0x12   : > { %s234_s21 = sshll.u32 %s384_s9, 7  ;;  %s233_s22 = sshll.u32 %s87_s20, 3 }
  0x13   : > { %s461_s25 = scalar_lea.hbm %s539_s0, %s234_s21  ;;  %s91_s26 = scalar_lea.vmem [#allocation2], %s233_s22 }
  0x14   : > { %s98_s27 = sshll.u32 %s91_s26, 4  ;;  %p465_p13 = pnand %p254_p10, %p437_p5  ;;  %s469_s27 = int_to_ptr.vmem [resolvable:$true] %s98_s27 }
  0x15   : > { %s88_s29 = scalar_lea.sflag [#allocation3], %s87_s20  ;;  %s292_s30 = scalar_lea.hbm %s461_s25, 128 }
  0x16   : > { %p293_p2 = scmp.ne.s32.totalorder %s461_s25, %s292_s30  ;;  %p294_p3 = pneg %p465_p13 }
  0x17   : > { %s297_s4 = scalar_lea.hbm %s539_s0, 256  ;;  %p298_p5 = scmp.lt.s32.totalorder %s461_s25, %s539_s0 }
  0x18   : > { %p295_p4 = pnand %p294_p3, %p293_p2  ;;  %p299_p8 = scmp.lt.s32.totalorder %s297_s4, %s292_s30 }
  0x1a   : > { %p296_p7 = pneg %p295_p4  ;;  %p300_p10 = por %p299_p8, %p298_p5 }
  0x1c   : > { %p301_p9 = pnand %p300_p10, %p296_p7 }
  0x1e   : > { %304 = shalt.err (!%p301_p9)
}
  0x1f   : > { %s305_s13 = scalar_lea.vmem %s469_s27, 128  ;;  %s386_s14 = smov [#allocation2]  }
  0x20   : > { %p306_p0 = scmp.ne.s32.totalorder %s469_s27, %s305_s13  ;;  %s310_s16 = sshll.u32 %s386_s14, 4  ;;  %s311_s16 = int_to_ptr.vmem [resolvable:$false] %s310_s16 }
  0x21   : > { %s312_s20 = scalar_lea.vmem %s311_s16, 256  ;;  %p313_p4 = scmp.lt.s32.totalorder %s469_s27, %s311_s16 }
  0x22   : > { %p308_p1 = pnand %p306_p0, %p294_p3  ;;  %p314_p12 = scmp.lt.s32.totalorder %s312_s20, %s305_s13 }
  0x24   : > { %p309_p2 = pneg %p308_p1  ;;  %p315_p11 = por %p314_p12, %p313_p4 }
  0x26   : > { %p316_p6 = pnand %p315_p11, %p309_p2 }
  0x28   : > { %319 = shalt.err (!%p316_p6)
}
  0x29   : > { %249 = dma.hbm_to_vmem [thread:$0]  (!%p465_p13), %s461_s25, 128, %s469_s27, %s88_s29  }
  0x2a   : > { %p548_p9 = scmp.lt.s32.totalorder %s384_s9, 3  ;;  %p549_p7 = scmp.ge.s32.totalorder %s384_s9, 1 }
  0x2c   : > { %p104_p0 = pnand %p549_p7, %p548_p9 }
  0x2d   : > { %s496_s21 = sand.u32 (!%p104_p0), 1, %s376_s7   ;;  %p550_p6 = scmp.ne.s32.totalorder (!%p104_p0), %s544_s17, 0 }
  0x2e   : > { %107 = sbr.rel (%p104_p0) target bundleno = 114 (0x72), region = 24  ;;  %s236_s22 = sshll.u32 (!%p104_p0), %s496_s21, 3 }
  0x2f   : > { %s110_s23 = scalar_lea.sflag (!%p104_p0), [#allocation3], %s496_s21  ;;  %s113_s24 = scalar_lea.vmem (!%p104_p0), [#allocation2], %s236_s22 }
  0x33   : > { %363 = dma.done.wait (%p550_p6), %s110_s23, 128  }
  0x34   : > { %365 = vsyncadd (%p550_p6), %s110_s23, 4294967168  ;;  %v132_v0 = vld [vmem:[%s113_s24] sm:$0xff]  ;;  %s131_s25 = scalar_lea.vmem [#allocation5], %s236_s22  ;;  %s239_s17 = sshll.u32 %s419_s10, 7 }
  0x35   : > { %v133_v1 = vmin.f32 %v132_v0, 20.0  ;;  %s160_s26 = sshll.u32 %s131_s25, 4  ;;  %s158_s29 = scalar_lea.hbm %s540_s1, %s239_s17  ;;  %s161_s26 = int_to_ptr.vmem [resolvable:$true] %s160_s26 }
  0x36   : > { %s147_s30 = scalar_lea.sflag [#allocation4], %s496_s21  ;;  %s320_s2 = scalar_lea.vmem %s161_s26, 128 }
  0x37   : > { %v134_v2 = vmul.f32 1.442695, %v133_v1  ;;  %p321_p11 = scmp.ne.s32.totalorder %s161_s26, %s320_s2  ;;  %p551_p12 = scmp.ne.s32.totalorder %s545_s18, 0 }
  0x38   : > { %s387_s3 = smov [#allocation5]  }
  0x39   : > { %288 = vpow2.f32 %v134_v2  ;;  %p322_p13 = pnand %p321_p11, %p551_p12  ;;  %s324_s4 = sshll.u32 %s387_s3, 4  ;;  %s325_s4 = int_to_ptr.vmem [resolvable:$false] %s324_s4 }
  0x3a   : > { %s326_s5 = scalar_lea.vmem %s325_s4, 256  ;;  %p327_p3 = scmp.lt.s32.totalorder %s161_s26, %s325_s4 }
  0x3b   : > { %p323_p1 = pneg %p322_p13  ;;  %p328_p5 = scmp.lt.s32.totalorder %s326_s5, %s320_s2 }
  0x3d   : > { %p329_p8 = por %p328_p5, %p327_p3 }
  0x3f   : > { %p330_p10 = pnand %p329_p8, %p323_p1 }
  0x46   : > { %v289_v3 = vpop.eup %288 }
  0x47   : > { %v136_v4 = vadd.f32 2.0, %v289_v3 }
  0x49   : > { %v137_v5 = vmul.f32 %v289_v3, %v136_v4 }
  0x4b   : > { %v138_v6 = vadd.f32 2.0, %v137_v5 }
  0x4d   : > { %290 = vrcp.f32 %v138_v6 }
  0x5a   : > { %v291_v7 = vpop.eup %290 }
  0x5b   : > { %v140_v8 = vmul.f32 %v291_v7, %v138_v6 }
  0x5d   : > { %v141_v9 = vsub.f32 2.0, %v140_v8 }
  0x5f   : > { %v142_v10 = vmul.f32 %v291_v7, %v141_v9 }
  0x61   : > { %v143_v11 = vmul.f32 %v142_v10, %v137_v5 }
  0x63   : > { %v144_v12 = vmul.f32 %v143_v11, %v132_v0 }
  0x65   : > { %145 = vst [vmem:[%s131_s25] sm:$0xff] %v144_v12 }
  0x66   : > { %333 = shalt.err (!%p330_p10)
}
  0x67   : > { %s334_s10 = scalar_lea.hbm %s158_s29, 128  ;;  %s338_s14 = scalar_lea.hbm %s540_s1, 256 }
  0x68   : > { %p335_p2 = scmp.ne.s32.totalorder %s158_s29, %s334_s10  ;;  %p339_p7 = scmp.lt.s32.totalorder %s158_s29, %s540_s1 }
  0x69   : > { %p340_p0 = scmp.lt.s32.totalorder %s338_s14, %s334_s10 }
  0x6a   : > { %p336_p4 = pnand %p335_p2, %p551_p12 }
  0x6b   : > { %p341_p6 = por %p340_p0, %p339_p7 }
  0x6c   : > { %p337_p9 = pneg %p336_p4 }
  0x6e   : > { %p342_p11 = pnand %p341_p6, %p337_p9 }
  0x70   : > { %345 = shalt.err (!%p342_p11)
}
  0x71   : > { %244 = dma.vmem_to_hbm [thread:$0]  (%p551_p12), %s161_s26, 128, %s158_s29, %s147_s30  }
  0x72 PF: > { %s172_s21 = sand.u32 1, %s372_s6   ;;  %p552_p13 = scmp.ne.s32.totalorder %s546_s19, 0 }
  0x73   : > { %p553_p1 = scmp.ge.s32.totalorder %s384_s9, 2  ;;  %s173_s22 = scalar_lea.sflag [#allocation4], %s172_s21 }
  0x75   : > { %p251_p3 = pnand %p553_p1, %p552_p13 }
  0x77   : > { %p252_p5 = pneg %p251_p3 }
  0x79   : > { %367 = dma.done.wait (%p252_p5), %s173_s22, 128  }
  0x7a   : > { %369 = vsyncadd (%p252_p5), %s173_s22, 4294967168  ;;  %p14_p8 = scmp.ge.s32.totalorder %s423_s12, 4   ;;  %s554_s6 = smov %s376_s7 }
  0x7b   : > { %s555_s7 = smov %s380_s8  ;;  %s556_s8 = smov %s435_s15 }
  0x7c   : > { %s557_s9 = smov %s423_s12  ;;  %16 = sbr.rel (!%p14_p8) target bundleno = 5 (0x5), region = 69 }
  0x81   :  { %178 = vsyncpa [#allocation3], 1 }
  0x82   :  { %180 = vsyncpa [#allocation3 + $0x1], 1 }
  0x83   :  { %181 = vsyncpa [#allocation4], 1 }
  0x84   :  { %183 = vsyncpa [#allocation4 + $0x1], 1 }

</bundles_post_ra>
